<compile_context>
chip_gen: v7x
topology: tpu7x:2x2x1
jax: 0.10.0
libtpu: 0.0.40
codegen_flags: <defaults>
</compile_context>

<pallas_src>
import math

import jax
import jax.numpy as jnp
from jax.experimental import pallas as pl
from jax.experimental.pallas import tpu as pltpu

# Layer sizes straight from the module definition.
DIMS = [204, 128, 64, 32, 64, 128, 204]
MAX_TILE_M = 1024        # rows per grid step; VMEM footprint stays well under limits
MEGACORE_MIN_B = 512     # once B >= this, force >= 2 grid steps (v7x has 2 TCs)


def _round_up(x, m):
    return (x + m - 1) // m * m


def _choose_tile_m(B):
    """Balanced batch tile: minimal tail padding, >=2 steps for megacore."""
    num_blocks = pl.cdiv(B, MAX_TILE_M)
    if num_blocks < 2 and B >= MEGACORE_MIN_B:
        num_blocks = 2                              # give both v7x TCs a grid step
    tile_m = _round_up(pl.cdiv(B, num_blocks), 16)  # 16: bf16 sublane packing
    return min(tile_m, _round_up(B, 8))             # never overshoot tiny batches


def _autoencoder_kernel(x_ref,
                        w0, b0, w1, b1, w2, b2,     # encoder
                        w3, b3, w4, b4, w5, b5,     # decoder
                        o_ref):
    def layer(h, w_ref, b_ref, activate):
        # bf16 x bf16 -> f32 accumulate on the MXU; bias-add in f32.
        z = jnp.dot(h, w_ref[...], preferred_element_type=jnp.float32) + b_ref[...]
        if activate:
            # tanh in f32 (EUP), back to bf16 for the next matmul.
            return jnp.tanh(z).astype(jnp.bfloat16)
        return z

    h = x_ref[...].astype(jnp.bfloat16)   # in-kernel f32 -> bf16 cast (no wrapper pass)
    h = layer(h, w0, b0, True)
    h = layer(h, w1, b1, True)
    h = layer(h, w2, b2, True)
    h = layer(h, w3, b3, True)
    h = layer(h, w4, b4, True)
    o_ref[...] = layer(h, w5, b5, False).astype(o_ref.dtype)   # final layer: no tanh


def autoencoder_forward(x, params):
    """x: [B, 204] float32; params: list of (W [in,out] f32, b [1,out] f32)."""
    B, d_in = x.shape
    assert d_in == DIMS[0]

    tile_m = _choose_tile_m(B)
    grid = (pl.cdiv(B, tile_m),)   # ragged last block handled by Pallas (rows independent)

    # Streamed input: un-padded, un-cast [tile_m, 204] f32 blocks.
    in_specs = [pl.BlockSpec((tile_m, DIMS[0]), lambda i: (i, 0))]
    flat_args = []
    weight_bytes = 0
    for w, b in params:
        w_bf16 = w.astype(jnp.bfloat16)   # one-time tiny cast; weights are ~170 KiB total
        flat_args += [w_bf16, b]
        # Full-array blocks with constant index_map -> VMEM-resident across grid steps.
        in_specs.append(pl.BlockSpec(w_bf16.shape, lambda i: (0, 0)))
        in_specs.append(pl.BlockSpec(b.shape, lambda i: (0, 0)))
        weight_bytes += w_bf16.size * 2 + b.size * 4

    flops = 2 * B * sum(DIMS[i] * DIMS[i + 1] for i in range(len(DIMS) - 1))
    transcendentals = B * sum(DIMS[1:-1])
    bytes_accessed = B * DIMS[0] * 4 + B * DIMS[-1] * 4 + weight_bytes

    return pl.pallas_call(
        _autoencoder_kernel,
        out_shape=jax.ShapeDtypeStruct((B, DIMS[-1]), jnp.float32),
        grid=grid,
        in_specs=in_specs,
        out_specs=pl.BlockSpec((tile_m, DIMS[-1]), lambda i: (i, 0)),
        compiler_params=pltpu.CompilerParams(
            dimension_semantics=("parallel",),
            vmem_limit_bytes=64 * 1024 * 1024),   # headroom for 1024-row tiles on v5e
        cost_estimate=pl.CostEstimate(
            flops=flops,
            transcendentals=transcendentals,
            bytes_accessed=bytes_accessed),
    )(x, *flat_args)


def init_params(key):
    """Xavier-uniform weights (nn.init.xavier_uniform_), zero biases.

    Stored as [in, out] so the kernel computes x @ W + b without transposes
    (equivalent in distribution to PyTorch's [out, in] xavier init).
    """
    params = []
    for i in range(len(DIMS) - 1):
        fan_in, fan_out = DIMS[i], DIMS[i + 1]
        key, sub = jax.random.split(key)
        limit = math.sqrt(6.0 / (fan_in + fan_out))
        w = jax.random.uniform(sub, (fan_in, fan_out), jnp.float32,
                               minval=-limit, maxval=limit)
        b = jnp.zeros((1, fan_out), jnp.float32)
        params.append((w, b))
    return params


def reference_forward(x, params):
    """Pure-JAX f32 reference (matches the PyTorch module semantics)."""
    h = x
    n = len(params)
    for i, (w, b) in enumerate(params):
        h = h @ w + b
        if i != n - 1:
            h = jnp.tanh(h)
    return h


if __name__ == "__main__":
    key = jax.random.PRNGKey(0)
    pkey, xkey1, xkey2 = jax.random.split(key, 3)
    params = init_params(pkey)

    # Test 1: small batch (single grid step, exact 8-row tile).
    batch = 8
    x = jax.random.normal(xkey1, (batch, DIMS[0]), jnp.float32)
    out = jax.block_until_ready(autoencoder_forward(x, params))
    ref = reference_forward(x, params)
    assert out.shape == (batch, DIMS[-1])
    # bf16 matmuls with f32 accumulation -> loosened tolerance vs the f32 reference.
    assert jnp.allclose(out, ref, atol=5e-2, rtol=5e-2), "mismatch vs JAX reference (small batch)"

    # Test 2: batch that exercises 2 grid steps (v7x megacore path) + ragged tail.
    batch2 = 520   # -> tile_m=272, grid=(2,), last block has 248 valid rows
    x2 = jax.random.normal(xkey2, (batch2, DIMS[0]), jnp.float32)
    out2 = jax.block_until_ready(autoencoder_forward(x2, params))
    ref2 = reference_forward(x2, params)
    assert out2.shape == (batch2, DIMS[-1])
    assert jnp.allclose(out2, ref2, atol=5e-2, rtol=5e-2), "mismatch vs JAX reference (gridded batch)"

    print("KERNEL_OK")
</pallas_src>

<mosaic_0001>
module attributes {stable_mosaic.version = 11 : i64} {
  func.func @_autoencoder_kernel(%arg0: i32, %arg1: memref<8x204xf32, #tpu.memory_space<vmem>>, %arg2: memref<204x128xbf16, #tpu.memory_space<vmem>>, %arg3: memref<1x128xf32, #tpu.memory_space<vmem>>, %arg4: memref<128x64xbf16, #tpu.memory_space<vmem>>, %arg5: memref<1x64xf32, #tpu.memory_space<vmem>>, %arg6: memref<64x32xbf16, #tpu.memory_space<vmem>>, %arg7: memref<1x32xf32, #tpu.memory_space<vmem>>, %arg8: memref<32x64xbf16, #tpu.memory_space<vmem>>, %arg9: memref<1x64xf32, #tpu.memory_space<vmem>>, %arg10: memref<64x128xbf16, #tpu.memory_space<vmem>>, %arg11: memref<1x128xf32, #tpu.memory_space<vmem>>, %arg12: memref<128x204xbf16, #tpu.memory_space<vmem>>, %arg13: memref<1x204xf32, #tpu.memory_space<vmem>>, %arg14: memref<8x204xf32, #tpu.memory_space<vmem>>) attributes {dimension_semantics = [#tpu.dimension_semantics<parallel>], iteration_bounds = array<i64: 1>, scalar_prefetch = 0 : i64, scratch_operands = 0 : i64, tpu.core_type = #tpu.core_type<tc>, window_params = [{transform_indices = @transform_0, window_bounds = array<i64: 8, 204>}, {pipeline_mode = #tpu.pipeline_mode<synchronous>, transform_indices = @transform_1, window_bounds = array<i64: 204, 128>}, {pipeline_mode = #tpu.pipeline_mode<synchronous>, transform_indices = @transform_2, window_bounds = array<i64: 1, 128>}, {pipeline_mode = #tpu.pipeline_mode<synchronous>, transform_indices = @transform_3, window_bounds = array<i64: 128, 64>}, {pipeline_mode = #tpu.pipeline_mode<synchronous>, transform_indices = @transform_4, window_bounds = array<i64: 1, 64>}, {pipeline_mode = #tpu.pipeline_mode<synchronous>, transform_indices = @transform_5, window_bounds = array<i64: 64, 32>}, {pipeline_mode = #tpu.pipeline_mode<synchronous>, transform_indices = @transform_6, window_bounds = array<i64: 1, 32>}, {pipeline_mode = #tpu.pipeline_mode<synchronous>, transform_indices = @transform_7, window_bounds = array<i64: 32, 64>}, {pipeline_mode = #tpu.pipeline_mode<synchronous>, transform_indices = @transform_8, window_bounds = array<i64: 1, 64>}, {pipeline_mode = #tpu.pipeline_mode<synchronous>, transform_indices = @transform_9, window_bounds = array<i64: 64, 128>}, {pipeline_mode = #tpu.pipeline_mode<synchronous>, transform_indices = @transform_10, window_bounds = array<i64: 1, 128>}, {pipeline_mode = #tpu.pipeline_mode<synchronous>, transform_indices = @transform_11, window_bounds = array<i64: 128, 204>}, {pipeline_mode = #tpu.pipeline_mode<synchronous>, transform_indices = @transform_12, window_bounds = array<i64: 1, 204>}, {transform_indices = @transform_13, window_bounds = array<i64: 8, 204>}]} {
    %c0 = arith.constant 0 : index
    %c0_0 = arith.constant 0 : index
    %0 = vector.load %arg1[%c0, %c0_0] : memref<8x204xf32, #tpu.memory_space<vmem>>, vector<8x204xf32>
    %1 = arith.truncf %0 : vector<8x204xf32> to vector<8x204xbf16>
    %c0_1 = arith.constant 0 : index
    %c0_2 = arith.constant 0 : index
    %2 = vector.load %arg2[%c0_1, %c0_2] : memref<204x128xbf16, #tpu.memory_space<vmem>>, vector<204x128xbf16>
    %cst = arith.constant dense<0.000000e+00> : vector<8x128xf32>
    %3 = tpu.matmul %1, %2, %cst {dimension_numbers = #tpu.dot_dimension_numbers<[1], [0], [0], [1], [0, 0, 1, 1], [], []>} : vector<8x204xbf16>, vector<204x128xbf16>, vector<8x128xf32> -> vector<8x128xf32>
    %c0_3 = arith.constant 0 : index
    %c0_4 = arith.constant 0 : index
    %4 = vector.load %arg3[%c0_3, %c0_4] : memref<1x128xf32, #tpu.memory_space<vmem>>, vector<1x128xf32>
    %5 = vector.broadcast %4 : vector<1x128xf32> to vector<8x128xf32>
    %6 = arith.addf %3, %5 : vector<8x128xf32>
    %7 = math.tanh %6 : vector<8x128xf32>
    %8 = arith.truncf %7 : vector<8x128xf32> to vector<8x128xbf16>
    %c0_5 = arith.constant 0 : index
    %c0_6 = arith.constant 0 : index
    %9 = vector.load %arg4[%c0_5, %c0_6] : memref<128x64xbf16, #tpu.memory_space<vmem>>, vector<128x64xbf16>
    %cst_7 = arith.constant dense<0.000000e+00> : vector<8x64xf32>
    %10 = tpu.matmul %8, %9, %cst_7 {dimension_numbers = #tpu.dot_dimension_numbers<[1], [0], [0], [1], [0, 0, 1, 1], [], []>} : vector<8x128xbf16>, vector<128x64xbf16>, vector<8x64xf32> -> vector<8x64xf32>
    %c0_8 = arith.constant 0 : index
    %c0_9 = arith.constant 0 : index
    %11 = vector.load %arg5[%c0_8, %c0_9] : memref<1x64xf32, #tpu.memory_space<vmem>>, vector<1x64xf32>
    %12 = vector.broadcast %11 : vector<1x64xf32> to vector<8x64xf32>
    %13 = arith.addf %10, %12 : vector<8x64xf32>
    %14 = math.tanh %13 : vector<8x64xf32>
    %15 = arith.truncf %14 : vector<8x64xf32> to vector<8x64xbf16>
    %c0_10 = arith.constant 0 : index
    %c0_11 = arith.constant 0 : index
    %16 = vector.load %arg6[%c0_10, %c0_11] : memref<64x32xbf16, #tpu.memory_space<vmem>>, vector<64x32xbf16>
    %cst_12 = arith.constant dense<0.000000e+00> : vector<8x32xf32>
    %17 = tpu.matmul %15, %16, %cst_12 {dimension_numbers = #tpu.dot_dimension_numbers<[1], [0], [0], [1], [0, 0, 1, 1], [], []>} : vector<8x64xbf16>, vector<64x32xbf16>, vector<8x32xf32> -> vector<8x32xf32>
    %c0_13 = arith.constant 0 : index
    %c0_14 = arith.constant 0 : index
    %18 = vector.load %arg7[%c0_13, %c0_14] : memref<1x32xf32, #tpu.memory_space<vmem>>, vector<1x32xf32>
    %19 = vector.broadcast %18 : vector<1x32xf32> to vector<8x32xf32>
    %20 = arith.addf %17, %19 : vector<8x32xf32>
    %21 = math.tanh %20 : vector<8x32xf32>
    %22 = arith.truncf %21 : vector<8x32xf32> to vector<8x32xbf16>
    %c0_15 = arith.constant 0 : index
    %c0_16 = arith.constant 0 : index
    %23 = vector.load %arg8[%c0_15, %c0_16] : memref<32x64xbf16, #tpu.memory_space<vmem>>, vector<32x64xbf16>
    %cst_17 = arith.constant dense<0.000000e+00> : vector<8x64xf32>
    %24 = tpu.matmul %22, %23, %cst_17 {dimension_numbers = #tpu.dot_dimension_numbers<[1], [0], [0], [1], [0, 0, 1, 1], [], []>} : vector<8x32xbf16>, vector<32x64xbf16>, vector<8x64xf32> -> vector<8x64xf32>
    %c0_18 = arith.constant 0 : index
    %c0_19 = arith.constant 0 : index
    %25 = vector.load %arg9[%c0_18, %c0_19] : memref<1x64xf32, #tpu.memory_space<vmem>>, vector<1x64xf32>
    %26 = vector.broadcast %25 : vector<1x64xf32> to vector<8x64xf32>
    %27 = arith.addf %24, %26 : vector<8x64xf32>
    %28 = math.tanh %27 : vector<8x64xf32>
    %29 = arith.truncf %28 : vector<8x64xf32> to vector<8x64xbf16>
    %c0_20 = arith.constant 0 : index
    %c0_21 = arith.constant 0 : index
    %30 = vector.load %arg10[%c0_20, %c0_21] : memref<64x128xbf16, #tpu.memory_space<vmem>>, vector<64x128xbf16>
    %cst_22 = arith.constant dense<0.000000e+00> : vector<8x128xf32>
    %31 = tpu.matmul %29, %30, %cst_22 {dimension_numbers = #tpu.dot_dimension_numbers<[1], [0], [0], [1], [0, 0, 1, 1], [], []>} : vector<8x64xbf16>, vector<64x128xbf16>, vector<8x128xf32> -> vector<8x128xf32>
    %c0_23 = arith.constant 0 : index
    %c0_24 = arith.constant 0 : index
    %32 = vector.load %arg11[%c0_23, %c0_24] : memref<1x128xf32, #tpu.memory_space<vmem>>, vector<1x128xf32>
    %33 = vector.broadcast %32 : vector<1x128xf32> to vector<8x128xf32>
    %34 = arith.addf %31, %33 : vector<8x128xf32>
    %35 = math.tanh %34 : vector<8x128xf32>
    %36 = arith.truncf %35 : vector<8x128xf32> to vector<8x128xbf16>
    %c0_25 = arith.constant 0 : index
    %c0_26 = arith.constant 0 : index
    %37 = vector.load %arg12[%c0_25, %c0_26] : memref<128x204xbf16, #tpu.memory_space<vmem>>, vector<128x204xbf16>
    %cst_27 = arith.constant dense<0.000000e+00> : vector<8x204xf32>
    %38 = tpu.matmul %36, %37, %cst_27 {dimension_numbers = #tpu.dot_dimension_numbers<[1], [0], [0], [1], [0, 0, 1, 1], [], []>} : vector<8x128xbf16>, vector<128x204xbf16>, vector<8x204xf32> -> vector<8x204xf32>
    %c0_28 = arith.constant 0 : index
    %c0_29 = arith.constant 0 : index
    %39 = vector.load %arg13[%c0_28, %c0_29] : memref<1x204xf32, #tpu.memory_space<vmem>>, vector<1x204xf32>
    %40 = vector.broadcast %39 : vector<1x204xf32> to vector<8x204xf32>
    %41 = arith.addf %38, %40 : vector<8x204xf32>
    %c0_30 = arith.constant 0 : index
    %c0_31 = arith.constant 0 : index
    %42 = vector.load %arg14[%c0_30, %c0_31] : memref<8x204xf32, #tpu.memory_space<vmem>>, vector<8x204xf32>
    tpu.vector_store %arg14[%c0_30, %c0_31], %41 {strides = array<i32>} : memref<8x204xf32, #tpu.memory_space<vmem>>, vector<8x204xf32>,
    return
  }
  func.func @transform_0(%arg0: i32) -> (i32, i32) {
    %c0_i32 = arith.constant 0 : i32
    %c0_i32_0 = arith.constant 0 : i32
    return %arg0, %c0_i32 : i32, i32
  }
  func.func @transform_1(%arg0: i32) -> (i32, i32) {
    %c0_i32 = arith.constant 0 : i32
    %c0_i32_0 = arith.constant 0 : i32
    %c0_i32_1 = arith.constant 0 : i32
    return %c0_i32, %c0_i32_0 : i32, i32
  }
  func.func @transform_2(%arg0: i32) -> (i32, i32) {
    %c0_i32 = arith.constant 0 : i32
    %c0_i32_0 = arith.constant 0 : i32
    %c0_i32_1 = arith.constant 0 : i32
    return %c0_i32, %c0_i32_0 : i32, i32
  }
  func.func @transform_3(%arg0: i32) -> (i32, i32) {
    %c0_i32 = arith.constant 0 : i32
    %c0_i32_0 = arith.constant 0 : i32
    %c0_i32_1 = arith.constant 0 : i32
    return %c0_i32, %c0_i32_0 : i32, i32
  }
  func.func @transform_4(%arg0: i32) -> (i32, i32) {
    %c0_i32 = arith.constant 0 : i32
    %c0_i32_0 = arith.constant 0 : i32
    %c0_i32_1 = arith.constant 0 : i32
    return %c0_i32, %c0_i32_0 : i32, i32
  }
  func.func @transform_5(%arg0: i32) -> (i32, i32) {
    %c0_i32 = arith.constant 0 : i32
    %c0_i32_0 = arith.constant 0 : i32
    %c0_i32_1 = arith.constant 0 : i32
    return %c0_i32, %c0_i32_0 : i32, i32
  }
  func.func @transform_6(%arg0: i32) -> (i32, i32) {
    %c0_i32 = arith.constant 0 : i32
    %c0_i32_0 = arith.constant 0 : i32
    %c0_i32_1 = arith.constant 0 : i32
    return %c0_i32, %c0_i32_0 : i32, i32
  }
  func.func @transform_7(%arg0: i32) -> (i32, i32) {
    %c0_i32 = arith.constant 0 : i32
    %c0_i32_0 = arith.constant 0 : i32
    %c0_i32_1 = arith.constant 0 : i32
    return %c0_i32, %c0_i32_0 : i32, i32
  }
  func.func @transform_8(%arg0: i32) -> (i32, i32) {
    %c0_i32 = arith.constant 0 : i32
    %c0_i32_0 = arith.constant 0 : i32
    %c0_i32_1 = arith.constant 0 : i32
    return %c0_i32, %c0_i32_0 : i32, i32
  }
  func.func @transform_9(%arg0: i32) -> (i32, i32) {
    %c0_i32 = arith.constant 0 : i32
    %c0_i32_0 = arith.constant 0 : i32
    %c0_i32_1 = arith.constant 0 : i32
    return %c0_i32, %c0_i32_0 : i32, i32
  }
  func.func @transform_10(%arg0: i32) -> (i32, i32) {
    %c0_i32 = arith.constant 0 : i32
    %c0_i32_0 = arith.constant 0 : i32
    %c0_i32_1 = arith.constant 0 : i32
    return %c0_i32, %c0_i32_0 : i32, i32
  }
  func.func @transform_11(%arg0: i32) -> (i32, i32) {
    %c0_i32 = arith.constant 0 : i32
    %c0_i32_0 = arith.constant 0 : i32
    %c0_i32_1 = arith.constant 0 : i32
    return %c0_i32, %c0_i32_0 : i32, i32
  }
  func.func @transform_12(%arg0: i32) -> (i32, i32) {
    %c0_i32 = arith.constant 0 : i32
    %c0_i32_0 = arith.constant 0 : i32
    %c0_i32_1 = arith.constant 0 : i32
    return %c0_i32, %c0_i32_0 : i32, i32
  }
  func.func @transform_13(%arg0: i32) -> (i32, i32) {
    %c0_i32 = arith.constant 0 : i32
    %c0_i32_0 = arith.constant 0 : i32
    return %arg0, %c0_i32 : i32, i32
  }
}

</mosaic_0001>

<bundles_post_ra>
// kernel: tpu_custom_call.1
= control target key start
LH: loop header
LB: loop body
LE: loop exit
PB: predicated region body
PF: predicated region fallthrough
CT: control target
= control target key end

     0   :  { %18 = vsyncpa [#allocation3], 0  ;;  %s1753_s0 = inlined_call_operand.hbm [shape: f32[8,204], index: 0, kind: input, shape index: {}]   ;;  %s1754_s1 = inlined_call_operand.hbm [shape: bf16[204,128], index: 1, kind: input, shape index: {}]   ;;  %s1755_s2 = inlined_call_operand.hbm [shape: f32[1,128], index: 2, kind: input, shape index: {}]   ;;  %s1756_s3 = inlined_call_operand.hbm [shape: bf16[128,64], index: 3, kind: input, shape index: {}]   ;;  %s1757_s4 = inlined_call_operand.hbm [shape: f32[1,64], index: 4, kind: input, shape index: {}]   ;;  %s1758_s5 = inlined_call_operand.hbm [shape: bf16[64,32], index: 5, kind: input, shape index: {}]   ;;  %s1759_s6 = inlined_call_operand.hbm [shape: f32[1,32], index: 6, kind: input, shape index: {}]   ;;  %s1760_s7 = inlined_call_operand.hbm [shape: bf16[32,64], index: 7, kind: input, shape index: {}]   ;;  %s1761_s8 = inlined_call_operand.hbm [shape: f32[1,64], index: 8, kind: input, shape index: {}]   ;;  %s1762_s9 = inlined_call_operand.hbm [shape: bf16[64,128], index: 9, kind: input, shape index: {}]   ;;  %s1763_s10 = inlined_call_operand.hbm [shape: f32[1,128], index: 10, kind: input, shape index: {}]   ;;  %s1764_s11 = inlined_call_operand.hbm [shape: bf16[128,204], index: 11, kind: input, shape index: {}]   ;;  %s1765_s12 = inlined_call_operand.hbm [shape: f32[1,204], index: 12, kind: input, shape index: {}]   ;;  %s1766_s13 = inlined_call_operand.hbm [shape: f32[8,204], index: 13, kind: output, shape index: {}]  }
   0x1   :  { %19 = vsyncpa [#allocation6], 0 }
   0x2   :  { %20 = vsyncpa [#allocation9], 0 }
   0x3   :  { %21 = vsyncpa [#allocation12], 0 }
   0x4   :  { %22 = vsyncpa [#allocation15], 0 }
   0x5   :  { %23 = vsyncpa [#allocation18], 0 }
   0x6   :  { %24 = vsyncpa [#allocation21], 0 }
   0x7   :  { %25 = vsyncpa [#allocation4], 0  ;;  %s1435_s25 = smov [#allocation5]   ;;  %s1111_s29 = scalar_lea.hbm %s1754_s1, 1664 }
   0x8   :  { %s41_s26 = sshll.u32 %s1435_s25, 4  ;;  %p1112_p0 = scmp.ne.s32.totalorder %s1754_s1, %s1111_s29  ;;  %s42_s26 = int_to_ptr.vmem [resolvable:$true] %s41_s26 }
   0x9   :  { %p1115_p1 = scmp.lt.u32.totalorder %s1111_s29, %s1754_s1 }
   0xb   :  { %p1117_p2 = pnand %p1115_p1, %p1112_p0 }
   0xd   :  { %1120 = shalt.err (!%p1117_p2)
}
   0xe   :  { %s1121_s17 = scalar_lea.vmem %s42_s26, 1664  ;;  %p1126_p4 = scmp.lt.s32.totalorder %s42_s26, %s42_s26 }
   0xf   :  { %p1122_p3 = scmp.ne.s32.totalorder %s42_s26, %s1121_s17  ;;  %p1127_p5 = scmp.lt.s32.totalorder %s1121_s17, %s1121_s17 }
  0x11   :  { %p1128_p6 = por %p1127_p5, %p1126_p4 }
  0x13   :  { %p1129_p7 = pnand %p1128_p6, %p1122_p3 }
  0x15   :  { %1132 = shalt.err (!%p1129_p7)
}
  0x16   :  { %s1436_s18 = smov 64   ;;  %s1437_s19 = smov 4  }
  0x17   :  { %47 = dma.hbm_to_vmem [thread:$0]  %s1754_s1, 1664, %s42_s26, [#allocation6], %s1436_s18, %s1436_s18, %s1437_s19  }
  0x18   :  { %s1438_s22 = smov [#allocation8]   ;;  %s1439_s24 = smov [#allocation11]  }
  0x19   :  { %s63_s23 = sshll.u32 %s1438_s22, 4  ;;  %s85_s25 = sshll.u32 %s1439_s24, 4  ;;  %s64_s23 = int_to_ptr.vmem [resolvable:$true] %s63_s23  ;;  %s86_s25 = int_to_ptr.vmem [resolvable:$true] %s85_s25 }
  0x1a   :  { %s1133_s29 = scalar_lea.hbm %s1756_s3, 1024 }
  0x1b   :  { %p1134_p8 = scmp.ne.s32.totalorder %s1756_s3, %s1133_s29  ;;  %p1137_p9 = scmp.lt.u32.totalorder %s1133_s29, %s1756_s3 }
  0x1d   :  { %p1139_p10 = pnand %p1137_p9, %p1134_p8 }
  0x1f   :  { %1142 = shalt.err (!%p1139_p10)
}
  0x20   :  { %s1143_s1 = scalar_lea.vmem %s64_s23, 1024  ;;  %p1148_p12 = scmp.lt.s32.totalorder %s64_s23, %s64_s23 }
  0x21   :  { %p1144_p11 = scmp.ne.s32.totalorder %s64_s23, %s1143_s1  ;;  %p1149_p13 = scmp.lt.s32.totalorder %s1143_s1, %s1143_s1 }
  0x23   :  { %p1150_p0 = por %p1149_p13, %p1148_p12 }
  0x25   :  { %p1151_p1 = pnand %p1150_p0, %p1144_p11 }
  0x27   :  { %1154 = shalt.err (!%p1151_p1)
}
  0x28   :  { %69 = dma.hbm_to_vmem [thread:$0]  %s1756_s3, 1024, %s64_s23, [#allocation9], %s1436_s18, %s1436_s18, %s1437_s19  }
  0x29   :  { %s1155_s22 = scalar_lea.hbm %s1758_s5, 512 }
  0x2a   :  { %p1156_p2 = scmp.ne.s32.totalorder %s1758_s5, %s1155_s22  ;;  %p1159_p3 = scmp.lt.u32.totalorder %s1155_s22, %s1758_s5 }
  0x2c   :  { %p1161_p4 = pnand %p1159_p3, %p1156_p2 }
  0x2e   :  { %1164 = shalt.err (!%p1161_p4)
}
  0x2f   :  { %s1165_s30 = scalar_lea.vmem %s86_s25, 512  ;;  %p1170_p6 = scmp.lt.s32.totalorder %s86_s25, %s86_s25 }
  0x30   :  { %p1166_p5 = scmp.ne.s32.totalorder %s86_s25, %s1165_s30  ;;  %p1171_p7 = scmp.lt.s32.totalorder %s1165_s30, %s1165_s30 }
  0x32   :  { %p1172_p8 = por %p1171_p7, %p1170_p6 }
  0x34   :  { %p1173_p9 = pnand %p1172_p8, %p1166_p5 }
  0x36   :  { %1176 = shalt.err (!%p1173_p9)
}
  0x37   :  { %91 = dma.hbm_to_vmem [thread:$0]  %s1758_s5, 512, %s86_s25, [#allocation12], %s1436_s18, %s1436_s18, %s1437_s19  }
  0x38   :  { %s1440_s14 = smov [#allocation14]   ;;  %s1441_s16 = smov [#allocation17]  }
  0x39   :  { %s107_s15 = sshll.u32 %s1440_s14, 4  ;;  %s129_s1 = sshll.u32 %s1441_s16, 4  ;;  %s108_s15 = int_to_ptr.vmem [resolvable:$true] %s107_s15  ;;  %s130_s1 = int_to_ptr.vmem [resolvable:$true] %s129_s1 }
  0x3a   :  { %s1177_s20 = scalar_lea.hbm %s1760_s7, 256 }
  0x3b   :  { %p1178_p10 = scmp.ne.s32.totalorder %s1760_s7, %s1177_s20  ;;  %p1181_p11 = scmp.lt.u32.totalorder %s1177_s20, %s1760_s7 }
  0x3d   :  { %p1183_p12 = pnand %p1181_p11, %p1178_p10 }
  0x3f   :  { %1186 = shalt.err (!%p1183_p12)
}
  0x40   :  { %s1187_s5 = scalar_lea.vmem %s108_s15, 256  ;;  %p1192_p0 = scmp.lt.s32.totalorder %s108_s15, %s108_s15 }
  0x41   :  { %p1188_p13 = scmp.ne.s32.totalorder %s108_s15, %s1187_s5  ;;  %p1193_p1 = scmp.lt.s32.totalorder %s1187_s5, %s1187_s5 }
  0x43   :  { %p1194_p2 = por %p1193_p1, %p1192_p0 }
  0x45   :  { %p1195_p3 = pnand %p1194_p2, %p1188_p13 }
  0x47   :  { %1198 = shalt.err (!%p1195_p3)
}
  0x48   :  { %113 = dma.hbm_to_vmem [thread:$0]  %s1760_s7, 256, %s108_s15, [#allocation15], %s1436_s18, %s1436_s18, %s1437_s19  }
  0x49   :  { %s1199_s3 = scalar_lea.hbm %s1762_s9, 512 }
  0x4a   :  { %p1200_p4 = scmp.ne.s32.totalorder %s1762_s9, %s1199_s3  ;;  %p1203_p5 = scmp.lt.u32.totalorder %s1199_s3, %s1762_s9 }
  0x4c   :  { %p1205_p6 = pnand %p1203_p5, %p1200_p4 }
  0x4e   :  { %1208 = shalt.err (!%p1205_p6)
}
  0x4f   :  { %s1209_s17 = scalar_lea.vmem %s130_s1, 512  ;;  %p1214_p8 = scmp.lt.s32.totalorder %s130_s1, %s130_s1 }
  0x50   :  { %p1210_p7 = scmp.ne.s32.totalorder %s130_s1, %s1209_s17  ;;  %p1215_p9 = scmp.lt.s32.totalorder %s1209_s17, %s1209_s17 }
  0x52   :  { %p1216_p10 = por %p1215_p9, %p1214_p8 }
  0x54   :  { %p1217_p11 = pnand %p1216_p10, %p1210_p7 }
  0x56   :  { %1220 = shalt.err (!%p1217_p11)
}
  0x57   :  { %135 = dma.hbm_to_vmem [thread:$0]  %s1762_s9, 512, %s130_s1, [#allocation18], %s1436_s18, %s1436_s18, %s1437_s19  }
  0x58   :  { %s1442_s20 = smov [#allocation20]   ;;  %s1221_s27 = scalar_lea.hbm %s1764_s11, 2048 }
  0x59   :  { %s151_s21 = sshll.u32 %s1442_s20, 4  ;;  %p1222_p12 = scmp.ne.s32.totalorder %s1764_s11, %s1221_s27  ;;  %s152_s21 = int_to_ptr.vmem [resolvable:$true] %s151_s21 }
  0x5a   :  { %p1225_p13 = scmp.lt.u32.totalorder %s1221_s27, %s1764_s11 }
  0x5c   :  { %p1227_p0 = pnand %p1225_p13, %p1222_p12 }
  0x5e   :  { %1230 = shalt.err (!%p1227_p0)
}
  0x5f   :  { %s1231_s30 = scalar_lea.vmem %s152_s21, 2048  ;;  %p1236_p2 = scmp.lt.s32.totalorder %s152_s21, %s152_s21 }
  0x60   :  { %p1232_p1 = scmp.ne.s32.totalorder %s152_s21, %s1231_s30  ;;  %p1237_p3 = scmp.lt.s32.totalorder %s1231_s30, %s1231_s30 }
  0x62   :  { %p1238_p4 = por %p1237_p3, %p1236_p2 }
  0x64   :  { %p1239_p5 = pnand %p1238_p4, %p1232_p1 }
  0x66   :  { %1242 = shalt.err (!%p1239_p5)
}
  0x67   :  { %s1443_s9 = smov 128   ;;  %s1444_s18 = smov 8  }
  0x68   :  { %157 = dma.hbm_to_vmem [thread:$0]  %s1764_s11, 2048, %s152_s21, [#allocation21], %s1443_s9, %s1443_s9, %s1444_s18  }
  0x69   :  { %s1445_s3 = smov [#allocation2]   ;;  %s1446_s14 = smov [#allocation7]  }
  0x6a   :  { %s32_s23 = sshll.u32 %s1445_s3, 4  ;;  %s54_s16 = sshll.u32 %s1446_s14, 4  ;;  %s33_s23 = int_to_ptr.vmem [resolvable:$true] %s32_s23  ;;  %s55_s16 = int_to_ptr.vmem [resolvable:$true] %s54_s16 }
  0x6b   :  { %s1243_s7 = scalar_lea.hbm %s1753_s0, 256 }
  0x6c   :  { %p1244_p6 = scmp.ne.s32.totalorder %s1753_s0, %s1243_s7  ;;  %p1247_p7 = scmp.lt.u32.totalorder %s1243_s7, %s1753_s0 }
  0x6e   :  { %p1249_p8 = pnand %p1247_p7, %p1244_p6 }
  0x70   :  { %1252 = shalt.err (!%p1249_p8)
}
  0x71   :  { %s1253_s11 = scalar_lea.vmem %s33_s23, 256  ;;  %p1258_p10 = scmp.lt.s32.totalorder %s33_s23, %s33_s23 }
  0x72   :  { %p1254_p9 = scmp.ne.s32.totalorder %s33_s23, %s1253_s11  ;;  %p1259_p11 = scmp.lt.s32.totalorder %s1253_s11, %s1253_s11 }
  0x74   :  { %p1260_p12 = por %p1259_p11, %p1258_p10 }
  0x76   :  { %p1261_p13 = pnand %p1260_p12, %p1254_p9 }
  0x78   :  { %1264 = shalt.err (!%p1261_p13)
}
  0x79   :  { %35 = dma.hbm_to_vmem [thread:$0]  %s1753_s0, 256, %s33_s23, [#allocation3]  }
  0x7a   :  { %s1265_s28 = scalar_lea.hbm %s1755_s2, 16 }
  0x7b   :  { %p1266_p0 = scmp.ne.s32.totalorder %s1755_s2, %s1265_s28  ;;  %p1269_p1 = scmp.lt.u32.totalorder %s1265_s28, %s1755_s2 }
  0x7d   :  { %p1271_p2 = pnand %p1269_p1, %p1266_p0 }
  0x7f   :  { %1274 = shalt.err (!%p1271_p2)
}
  0x80   :  { %s1275_s19 = scalar_lea.vmem %s55_s16, 16  ;;  %s1279_s1 = scalar_lea.vmem %s55_s16, 32 }
  0x81   :  { %p1276_p3 = scmp.ne.s32.totalorder %s55_s16, %s1275_s19  ;;  %p1280_p4 = scmp.lt.s32.totalorder %s55_s16, %s55_s16 }
  0x82   :  { %p1281_p5 = scmp.lt.s32.totalorder %s1279_s1, %s1275_s19 }
  0x84   :  { %p1282_p6 = por %p1281_p5, %p1280_p4 }
  0x86   :  { %p1283_p7 = pnand %p1282_p6, %p1276_p3 }
  0x88   :  { %1286 = shalt.err (!%p1283_p7)
}
  0x89   :  { %57 = dma.hbm_to_vmem [thread:$0]  %s1755_s2, 16, %s55_s16, [#allocation6]  }
  0x8a   :  { %s1447_s23 = smov [#allocation10]   ;;  %s1448_s26 = smov [#allocation13]  }
  0x8b   :  { %s76_s14 = sshll.u32 %s1447_s23, 4  ;;  %s98_s17 = sshll.u32 %s1448_s26, 4  ;;  %s77_s14 = int_to_ptr.vmem [resolvable:$true] %s76_s14  ;;  %s99_s17 = int_to_ptr.vmem [resolvable:$true] %s98_s17 }
  0x8c   :  { %s1287_s20 = scalar_lea.hbm %s1757_s4, 16 }
  0x8d   :  { %p1288_p8 = scmp.ne.s32.totalorder %s1757_s4, %s1287_s20  ;;  %p1291_p9 = scmp.lt.u32.totalorder %s1287_s20, %s1757_s4 }
  0x8f   :  { %p1293_p10 = pnand %p1291_p9, %p1288_p8 }
  0x91   :  { %1296 = shalt.err (!%p1293_p10)
}
  0x92   :  { %s1297_s2 = scalar_lea.vmem %s77_s14, 16  ;;  %s1301_s16 = scalar_lea.vmem %s77_s14, 32 }
  0x93   :  { %p1298_p11 = scmp.ne.s32.totalorder %s77_s14, %s1297_s2  ;;  %p1302_p12 = scmp.lt.s32.totalorder %s77_s14, %s77_s14 }
  0x94   :  { %p1303_p13 = scmp.lt.s32.totalorder %s1301_s16, %s1297_s2 }
  0x96   :  { %p1304_p0 = por %p1303_p13, %p1302_p12 }
  0x98   :  { %p1305_p1 = pnand %p1304_p0, %p1298_p11 }
  0x9a   :  { %1308 = shalt.err (!%p1305_p1)
}
  0x9b   :  { %79 = dma.hbm_to_vmem [thread:$0]  %s1757_s4, 16, %s77_s14, [#allocation9]  }
  0x9c   :  { %s1309_s29 = scalar_lea.hbm %s1759_s6, 16 }
  0x9d   :  { %p1310_p2 = scmp.ne.s32.totalorder %s1759_s6, %s1309_s29  ;;  %p1313_p3 = scmp.lt.u32.totalorder %s1309_s29, %s1759_s6 }
  0x9f   :  { %p1315_p4 = pnand %p1313_p3, %p1310_p2 }
  0xa1   :  { %1318 = shalt.err (!%p1315_p4)
}
  0xa2   :  { %s1319_s1 = scalar_lea.vmem %s99_s17, 16  ;;  %s1323_s0 = scalar_lea.vmem %s99_s17, 32 }
  0xa3   :  { %p1320_p5 = scmp.ne.s32.totalorder %s99_s17, %s1319_s1  ;;  %p1324_p6 = scmp.lt.s32.totalorder %s99_s17, %s99_s17 }
  0xa4   :  { %p1325_p7 = scmp.lt.s32.totalorder %s1323_s0, %s1319_s1 }
  0xa6   :  { %p1326_p8 = por %p1325_p7, %p1324_p6 }
  0xa8   :  { %p1327_p9 = pnand %p1326_p8, %p1320_p5 }
  0xaa   :  { %1330 = shalt.err (!%p1327_p9)
}
  0xab   :  { %101 = dma.hbm_to_vmem [thread:$0]  %s1759_s6, 16, %s99_s17, [#allocation12]  }
  0xac   :  { %s1449_s23 = smov [#allocation16]   ;;  %s1450_s26 = smov [#allocation19]  }
  0xad   :  { %s120_s14 = sshll.u32 %s1449_s23, 4  ;;  %s142_s7 = sshll.u32 %s1450_s26, 4  ;;  %s121_s14 = int_to_ptr.vmem [resolvable:$true] %s120_s14  ;;  %s143_s7 = int_to_ptr.vmem [resolvable:$true] %s142_s7 }
  0xae   :  { %s1331_s22 = scalar_lea.hbm %s1761_s8, 16 }
  0xaf   :  { %p1332_p10 = scmp.ne.s32.totalorder %s1761_s8, %s1331_s22  ;;  %p1335_p11 = scmp.lt.u32.totalorder %s1331_s22, %s1761_s8 }
  0xb1   :  { %p1337_p12 = pnand %p1335_p11, %p1332_p10 }
  0xb3   :  { %1340 = shalt.err (!%p1337_p12)
}
  0xb4   :  { %s1341_s6 = scalar_lea.vmem %s121_s14, 16  ;;  %s1345_s17 = scalar_lea.vmem %s121_s14, 32 }
  0xb5   :  { %p1342_p13 = scmp.ne.s32.totalorder %s121_s14, %s1341_s6  ;;  %p1346_p0 = scmp.lt.s32.totalorder %s121_s14, %s121_s14 }
  0xb6   :  { %p1347_p1 = scmp.lt.s32.totalorder %s1345_s17, %s1341_s6 }
  0xb8   :  { %p1348_p2 = por %p1347_p1, %p1346_p0 }
  0xba   :  { %p1349_p3 = pnand %p1348_p2, %p1342_p13 }
  0xbc   :  { %1352 = shalt.err (!%p1349_p3)
}
  0xbd   :  { %123 = dma.hbm_to_vmem [thread:$0]  %s1761_s8, 16, %s121_s14, [#allocation15]  }
  0xbe   :  { %s1353_s28 = scalar_lea.hbm %s1763_s10, 16 }
  0xbf   :  { %p1354_p4 = scmp.ne.s32.totalorder %s1763_s10, %s1353_s28  ;;  %p1357_p5 = scmp.lt.u32.totalorder %s1353_s28, %s1763_s10 }
  0xc1   :  { %p1359_p6 = pnand %p1357_p5, %p1354_p4 }
  0xc3   :  { %1362 = shalt.err (!%p1359_p6)
}
  0xc4   :  { %s1363_s19 = scalar_lea.vmem %s143_s7, 16  ;;  %s1367_s1 = scalar_lea.vmem %s143_s7, 32 }
  0xc5   :  { %p1364_p7 = scmp.ne.s32.totalorder %s143_s7, %s1363_s19  ;;  %p1368_p8 = scmp.lt.s32.totalorder %s143_s7, %s143_s7 }
  0xc6   :  { %p1369_p9 = scmp.lt.s32.totalorder %s1367_s1, %s1363_s19 }
  0xc8   :  { %p1370_p10 = por %p1369_p9, %p1368_p8 }
  0xca   :  { %p1371_p11 = pnand %p1370_p10, %p1364_p7 }
  0xcc   :  { %1374 = shalt.err (!%p1371_p11)
}
  0xcd   :  { %145 = dma.hbm_to_vmem [thread:$0]  %s1763_s10, 16, %s143_s7, [#allocation18]  }
  0xce   :  { %s1451_s4 = smov [#allocation22]   ;;  %s1375_s26 = scalar_lea.hbm %s1765_s12, 32 }
  0xcf   :  { %s164_s3 = sshll.u32 %s1451_s4, 4  ;;  %p1376_p12 = scmp.ne.s32.totalorder %s1765_s12, %s1375_s26  ;;  %s165_s3 = int_to_ptr.vmem [resolvable:$true] %s164_s3 }
  0xd0   :  { %p1379_p13 = scmp.lt.u32.totalorder %s1375_s26, %s1765_s12 }
  0xd2   :  { %p1381_p0 = pnand %p1379_p13, %p1376_p12 }
  0xd4   :  { %1384 = shalt.err (!%p1381_p0)
}
  0xd5   :  { %s1385_s11 = scalar_lea.vmem %s165_s3, 32  ;;  %p1390_p2 = scmp.lt.s32.totalorder %s165_s3, %s165_s3 }
  0xd6   :  { %p1386_p1 = scmp.ne.s32.totalorder %s165_s3, %s1385_s11  ;;  %p1391_p3 = scmp.lt.s32.totalorder %s1385_s11, %s1385_s11 }
  0xd8   :  { %p1392_p4 = por %p1391_p3, %p1390_p2 }
  0xda   :  { %p1393_p5 = pnand %p1392_p4, %p1386_p1 }
  0xdc   :  { %1396 = shalt.err (!%p1393_p5)
}
  0xdd   :  { %167 = dma.hbm_to_vmem [thread:$0]  %s1765_s12, 32, %s165_s3, [#allocation21]  }
  0xde   :  { %1419 = dma.done.wait [#allocation3], 256  }
  0xdf   :  { %1420 = vsyncadd [#allocation3], 4294967040 }
  0xe0   :  { %1421 = dma.done.wait [#allocation6], 1680  }
  0xe1   :  { %1422 = vsyncadd [#allocation6], 4294965616 }
  0xe2   :  { %1423 = dma.done.wait [#allocation9], 1040  }
  0xe3   :  { %1424 = vsyncadd [#allocation9], 4294966256 }
  0xe4   :  { %1425 = dma.done.wait [#allocation12], 528  }
  0xe5   :  { %1426 = vsyncadd [#allocation12], 4294966768 }
  0xe6   :  { %1427 = dma.done.wait [#allocation15], 272  }
  0xe7   :  { %1428 = vsyncadd [#allocation15], 4294967024 }
  0xe8   :  { %1429 = dma.done.wait [#allocation18], 528  }
  0xe9   :  { %1430 = vsyncadd [#allocation18], 4294966768 }
  0xea   :  { %1431 = dma.done.wait [#allocation21], 2080  }
  0xeb   :  { %1432 = vsyncadd [#allocation21], 4294965216  ;;  %v1452_v0 = vmov 0   ;;  %v1453_v1 = vmov 0.0   ;;  %v1046_v2 = vld [vmem:[#allocation5] sm:$0xff]   ;;  %v1047_v3 = vld [vmem:[#allocation5 + $0x8] sm:$0xff]  }
  0xec   :  { %330 = vmatprep.subr.bf16.mxu0 %v1452_v0  ;;  %973 = vmatprep.subr.bf16.mxu1 %v1453_v1  ;;  %v1048_v4 = vld [vmem:[#allocation5 + $0x10] sm:$0xff]   ;;  %v1049_v5 = vld [vmem:[#allocation5 + $0x18] sm:$0xff]   ;;  %v1050_v6 = vld [vmem:[#allocation5 + $0x20] sm:$0xff]   ;;  %vm322_vm0 = vcmask 621568   ;;  %vm326_vm1 = vcmask 1045504   ;;  %vm1454_vm2 = vmmov 0  }
  0xed   :  { %331 = vmatpush1.bf16.msra.mxu0 %v1046_v2  ;;  %v209_v7 = vld [vmem:[#allocation2 + $0x8] sm:$0xff]  ;;  %v1059_v9 = vld [vmem:[#allocation8] sm:$0xff]   ;;  %v1062_v14 = vld [vmem:[#allocation8 + $0x18] sm:$0xff]   ;;  %989 = vmatprep.mubr.msk.bf16.mxu1 %vm1454_vm2, %v1453_v1  ;;  %vm524_vm3 = vcmask 523264   ;;  %vm593_vm4 = vcmask 261120   ;;  %s1455_s12 = smov [#allocation23]  }
  0xee   :  { %332 = vmatprep.subr.bf16.mxu0 %v1452_v0  ;;  %v211_v8 = vpack.c.bf16 %v209_v7, %v209_v7  ;;  %974 = vmatpush3.bf16.msra.mxu1 %v1059_v9  ;;  %v1060_v10 = vld [vmem:[#allocation8 + $0x8] sm:$0xff]   ;;  %v1051_v11 = vld [vmem:[#allocation5 + $0x28] sm:$0xff]   ;;  %v1061_v12 = vld [vmem:[#allocation8 + $0x10] sm:$0xff]   ;;  %s880_s21 = sshll.u32 %s1455_s12, 4  ;;  %s881_s21 = int_to_ptr.vmem [resolvable:$true] %s880_s21 }
  0xef   :  { %975 = vmatprep.subr.bf16.mxu1 %v1453_v1  ;;  %v1052_v13 = vld [vmem:[#allocation5 + $0x30] sm:$0xff]   ;;  %v1053_v15 = vld [vmem:[#allocation5 + $0x38] sm:$0xff]   ;;  %v1054_v16 = vld [vmem:[#allocation5 + $0x40] sm:$0xff]   ;;  %s1397_s2 = scalar_lea.vmem %s881_s21, 256  ;;  %p1402_p7 = scmp.lt.s32.totalorder %s881_s21, %s881_s21 }
  0xf0   :  { %909 = vmatprep.mubr.msk.bf16.mxu0 %vm322_vm0, %v211_v8  ;;  %v1055_v17 = vld [vmem:[#allocation5 + $0x48] sm:$0xff]   ;;  %v1056_v18 = vld [vmem:[#allocation5 + $0x50] sm:$0xff]   ;;  %v1057_v19 = vld [vmem:[#allocation5 + $0x58] sm:$0xff]   ;;  %p1398_p6 = scmp.ne.s32.totalorder %s881_s21, %s1397_s2  ;;  %p1403_p8 = scmp.lt.s32.totalorder %s1397_s2, %s1397_s2 }
  0xf1   :  { %333 = vmatpush1.bf16.msra.mxu0 %v1047_v3  ;;  %v1058_v20 = vld [vmem:[#allocation5 + $0x60] sm:$0x3f]   ;;  %v208_v21 = vld [vmem:[#allocation2] sm:$0xff]  ;;  %v895_v28 = vld [vmem:[#allocation7] ss:$0 sm:$0xff] }
  0xf2   :  { %334 = vmatprep.subr.bf16.mxu0 %v1452_v0  ;;  %976 = vmatpush3.bf16.msra.mxu1 %v1060_v10  ;;  %v328_v22 = vsel %vm326_vm1, %v1058_v20, 0  ;;  %v210_v23 = vpack.c.bf16 %v208_v21, %v208_v21  ;;  %v1063_v24 = vld [vmem:[#allocation8 + $0x20] sm:$0xff]   ;;  %v1064_v25 = vld [vmem:[#allocation8 + $0x28] sm:$0xff]   ;;  %v1065_v26 = vld [vmem:[#allocation8 + $0x30] sm:$0xff]   ;;  %p1404_p9 = por %p1403_p8, %p1402_p7 }
  0xf3   :  { %977 = vmatprep.subr.bf16.mxu1 %v1453_v1  ;;  %v1066_v27 = vld [vmem:[#allocation8 + $0x38] sm:$0xff]   ;;  %v1067_v36 = vld [vmem:[#allocation11] sm:$0xff]   ;;  %v1068_v37 = vld [vmem:[#allocation11 + $0x8] sm:$0xff]  }
  0xf4   :  { %v1069_v38 = vld [vmem:[#allocation11 + $0x10] sm:$0xff]   ;;  %v1070_v39 = vld [vmem:[#allocation11 + $0x18] sm:$0xff]   ;;  %v1071_v48 = vld [vmem:[#allocation14] sm:$0xff]   ;;  %p1405_p10 = pnand %p1404_p9, %p1398_p6 }
  0xf5   :  { %335 = vmatpush1.bf16.msra.mxu0 %v1048_v4  ;;  %v910_v40 = vld [vmem:[#allocation10] ss:$0 sm:$0xff]  ;;  %v1072_v49 = vld [vmem:[#allocation14 + $0x8] sm:$0xff]   ;;  %v919_v50 = vld [vmem:[#allocation13] ss:$0 sm:$0xff] }
  0xf6   :  { %336 = vmatprep.subr.bf16.mxu0 %v1452_v0  ;;  %978 = vmatpush3.bf16.msra.mxu1 %v1061_v12  ;;  %v1073_v58 = vld [vmem:[#allocation17] sm:$0xff]   ;;  %v1074_v59 = vld [vmem:[#allocation17 + $0x8] sm:$0xff]   ;;  %v1075_v60 = vld [vmem:[#allocation17 + $0x10] sm:$0xff]  }
  0xf7   :  { %979 = vmatprep.subr.bf16.mxu1 %v1453_v1  ;;  %v1076_v61 = vld [vmem:[#allocation17 + $0x18] sm:$0xff]   ;;  %v1077_v62 = vld [vmem:[#allocation20] ss:$8 sps:$4 sm:$0xff]   ;;  %v1079_v63 = vld [vmem:[#allocation20 + $0x4] ss:$8 sps:$4 sm:$0xff]  }
  0xf8   :  { %v1080_v2 = vld [vmem:[#allocation20 + $0x10] ss:$8 sps:$4 sm:$0xff]   ;;  %v1085_v3 = vld [vmem:[#allocation20 + $0x24] ss:$8 sps:$4 sm:$0xff]   ;;  %v1083_v4 = vld [vmem:[#allocation20 + $0x20] ss:$8 sps:$4 sm:$0xff]  }
  0xf9   :  { %337 = vmatpush1.bf16.msra.mxu0 %v1049_v5  ;;  %v1088_v5 = vld [vmem:[#allocation20 + $0x34] ss:$8 sps:$4 sm:$0xff]   ;;  %v1098_v21 = vld [vmem:[#allocation20 + $0x70] ss:$8 sps:$4 sm:$0xff]  }
  0xfa   :  { %338 = vmatprep.subr.bf16.mxu0 %v1452_v0  ;;  %980 = vmatpush3.bf16.msra.mxu1 %v1062_v14  ;;  %v925_v7 = vld [vmem:[#allocation16] ss:$0 sm:$0xff]  ;;  %v1091_v14 = vld [vmem:[#allocation20 + $0x44] ss:$8 sps:$4 sm:$0xff]  }
  0xfb   :  { %981 = vmatprep.subr.bf16.mxu1 %v1453_v1  ;;  %v1100_v20 = vld [vmem:[#allocation20 + $0x74] ss:$8 sps:$4 sm:$0xff]  }
  0xfd   :  { %339 = vmatpush1.bf16.msra.mxu0 %v1050_v6  ;;  %v1086_v6 = vld [vmem:[#allocation20 + $0x30] ss:$8 sps:$4 sm:$0xff]  }
  0xfe   :  { %340 = vmatprep.subr.bf16.mxu0 %v1452_v0  ;;  %982 = vmatpush3.bf16.msra.mxu1 %v1063_v24 }
  0xff   :  { %983 = vmatprep.subr.bf16.mxu1 %v1453_v1 }
 0x101   :  { %341 = vmatpush1.bf16.msra.mxu0 %v1051_v11 }
 0x102   :  { %342 = vmatprep.subr.bf16.mxu0 %v1452_v0  ;;  %984 = vmatpush3.bf16.msra.mxu1 %v1064_v25 }
 0x103   :  { %985 = vmatprep.subr.bf16.mxu1 %v1453_v1 }
 0x105   :  { %343 = vmatpush1.bf16.msra.mxu0 %v1052_v13 }
 0x106   :  { %344 = vmatprep.subr.bf16.mxu0 %v1452_v0  ;;  %986 = vmatpush3.bf16.msra.mxu1 %v1065_v26 }
 0x107   :  { %987 = vmatprep.subr.bf16.mxu1 %v1453_v1 }
 0x109   :  { %345 = vmatpush1.bf16.msra.mxu0 %v1053_v15  ;;  %v1089_v15 = vld [vmem:[#allocation20 + $0x40] ss:$8 sps:$4 sm:$0xff]  }
 0x10a   :  { %346 = vmatprep.subr.bf16.mxu0 %v1452_v0  ;;  %988 = vmatpush3.bf16.msra.mxu1 %v1066_v27 }
 0x10b   :  { %993 = vmatprep.subr.bf16.mxu1 %v1453_v1 }
 0x10d   :  { %347 = vmatpush1.bf16.msra.mxu0 %v1054_v16  ;;  %v1094_v16 = vld [vmem:[#allocation20 + $0x54] ss:$8 sps:$4 sm:$0xff]  }
 0x10e   :  { %348 = vmatprep.subr.bf16.mxu0 %v1452_v0 }
 0x111   :  { %349 = vmatpush1.bf16.msra.mxu0 %v1055_v17  ;;  %v1092_v17 = vld [vmem:[#allocation20 + $0x50] ss:$8 sps:$4 sm:$0xff]  }
 0x112   :  { %350 = vmatprep.subr.bf16.mxu0 %v1452_v0 }
 0x115   :  { %351 = vmatpush1.bf16.msra.mxu0 %v1056_v18  ;;  %v1097_v18 = vld [vmem:[#allocation20 + $0x64] ss:$8 sps:$4 sm:$0xff]  }
 0x116   :  { %352 = vmatprep.subr.bf16.mxu0 %v1452_v0 }
 0x119   :  { %353 = vmatpush1.bf16.msra.mxu0 %v1057_v19  ;;  %v1095_v19 = vld [vmem:[#allocation20 + $0x60] ss:$8 sps:$4 sm:$0xff]  }
 0x11a   :  { %354 = vmatprep.subr.bf16.mxu0 %v1452_v0 }
 0x11d   :  { %355 = vmatpush1.bf16.msra.mxu0 %v328_v22  ;;  %v929_v22 = vld [vmem:[#allocation19] ss:$0 sm:$0xff] }
 0x11e   :  { %1005 = vmatprep.subr.bf16.mxu0 %v1453_v1 }
 0x120   :  { %363 = vmatmul.mubr.bf16.vlgmr.msra.gmra.mrb[0].mxu0 %v210_v23 }
 0x121   :  { %1009 = vmatprep.mubr.msk.bf16.mxu0 %vm1454_vm2, %v1453_v1  ;;  %1006 = vmatpush3.bf16.msra.mxu0 %v1071_v48 }
 0x122   :  { %1007 = vmatprep.subr.bf16.mxu0 %v1453_v1 }
 0x125   :  { %1008 = vmatpush3.bf16.msra.mxu0 %v1072_v49 }
 0x126   :  { %1013 = vmatprep.subr.bf16.mxu0 %v1453_v1 }
 0x1f3   :  { %v364_v29 = vpop.f32.mrb[0].mxu0 }
 0x1f4   :  { %v365_v30 = vadd.f32 %v895_v28, %v364_v29  ;;  %v366_v31 = vpop.f32.mrb[1].mxu0 }
 0x1f5   :  { %v367_v32 = vpop.f32.mrb[2].mxu0 }
 0x1f6   :  { %1101 = vtanh.f32 %v365_v30  ;;  %v368_v33 = vpop.f32.mrb[3].mxu0  ;;  %v741_v30 = vlaneseq }
 0x1f7   :  { %v739_v33 = vld [vmem:[#allocation22] sm:$0x3] }
 0x1f8   :  { %v742_v31 = vshrl.u32 %v741_v30, 7 }
 0x1fa   :  { %v743_v32 = vsub.s32 0, %v742_v31 }
 0x200   :  { %v1102_v34 = vpop.eup %1101 }
 0x201   :  { %v371_v35 = vpack.c.bf16 %v1102_v34, %v1102_v34  ;;  %v747_v34 = vsub.s32 1, %v742_v31 }
 0x203   :  { %990 = vmatmul.mubr.bf16.vlgmr.msra.gmra.mrb[0].mxu1 %v371_v35  ;;  %v744_v35 = vrot.slane %v739_v33, %v743_v32 }
 0x204   :  { %1001 = vmatprep.mubr.msk.bf16.mxu1 %vm1454_vm2, %v1453_v1  ;;  %994 = vmatpush3.bf16.msra.mxu1 %v1067_v36  ;;  %v748_v36 = vrot.slane %v739_v33, %v747_v34 }
 0x205   :  { %995 = vmatprep.subr.bf16.mxu1 %v1453_v1 }
 0x208   :  { %996 = vmatpush3.bf16.msra.mxu1 %v1068_v37 }
 0x209   :  { %997 = vmatprep.subr.bf16.mxu1 %v1453_v1 }
 0x20c   :  { %998 = vmatpush3.bf16.msra.mxu1 %v1069_v38 }
 0x20d   :  { %999 = vmatprep.subr.bf16.mxu1 %v1453_v1 }
 0x210   :  { %1000 = vmatpush3.bf16.msra.mxu1 %v1070_v39 }
 0x211   :  { %831 = vmatprep.subr.bf16.mxu1 %v1079_v63 }
 0x2d6   :  { %v477_v41 = vpop.f32.mrb[0].mxu1 }
 0x2d7   :  { %v478_v42 = vadd.f32 %v910_v40, %v477_v41  ;;  %v991_v43 = vpop.f32.mrb[1].mxu1 }
 0x2d8   :  { %v480_v44 = vpop.f32.mrb[2].mxu1 }
 0x2d9   :  { %1103 = vtanh.f32 %v478_v42  ;;  %v992_v45 = vpop.f32.mrb[3].mxu1 }
 0x2e3   :  { %v1104_v46 = vpop.eup %1103 }
 0x2e4   :  { %v484_v47 = vpack.c.bf16 %v1104_v46, %v1104_v46 }
 0x2e6   :  { %1002 = vmatmul.mubr.msk.bf16.vlgmr.msra.gmra.mrb[4].mxu1 %vm524_vm3, %v484_v47 }
 0x2e7   :  { %863 = vmatprep.mubr.bf16.mxu1 %v1452_v0  ;;  %v1082_v0 = vld [vmem:[#allocation20 + $0x14] ss:$8 sps:$4 sm:$0xff]   ;;  %832 = vmatpush1.bf16.msra.mxu1 %v1077_v62 }
 0x2e8   :  { %833 = vmatprep.subr.bf16.mxu1 %v1082_v0 }
 0x2eb   :  { %834 = vmatpush1.bf16.msra.mxu1 %v1080_v2 }
 0x2ec   :  { %835 = vmatprep.subr.bf16.mxu1 %v1085_v3 }
 0x2ef   :  { %836 = vmatpush1.bf16.msra.mxu1 %v1083_v4 }
 0x2f0   :  { %837 = vmatprep.subr.bf16.mxu1 %v1088_v5 }
 0x2f3   :  { %838 = vmatpush1.bf16.msra.mxu1 %v1086_v6 }
 0x2f4   :  { %839 = vmatprep.subr.bf16.mxu1 %v1091_v14 }
 0x2f7   :  { %840 = vmatpush1.bf16.msra.mxu1 %v1089_v15 }
 0x2f8   :  { %841 = vmatprep.subr.bf16.mxu1 %v1094_v16 }
 0x2fb   :  { %842 = vmatpush1.bf16.msra.mxu1 %v1092_v17 }
 0x2fc   :  { %843 = vmatprep.subr.bf16.mxu1 %v1097_v18 }
 0x2ff   :  { %844 = vmatpush1.bf16.msra.mxu1 %v1095_v19 }
 0x300   :  { %845 = vmatprep.subr.bf16.mxu1 %v1100_v20 }
 0x303   :  { %846 = vmatpush1.bf16.msra.mxu1 %v1098_v21 }
 0x3b9   :  { %v562_v51 = vpop.f32.mrb[4].mxu1 }
 0x3ba   :  { %v563_v52 = vadd.f32 %v919_v50, %v562_v51  ;;  %v1003_v53 = vpop.f32.mrb[5].mxu1 }
 0x3bb   :  { %v565_v54 = vpop.f32.mrb[6].mxu1 }
 0x3bc   :  { %1105 = vtanh.f32 %v563_v52  ;;  %v1004_v55 = vpop.f32.mrb[7].mxu1 }
 0x3c6   :  { %v1106_v56 = vpop.eup %1105 }
 0x3c7   :  { %v569_v57 = vpack.c.bf16 %v1106_v56, %v1106_v56 }
 0x3c9   :  { %1010 = vmatmul.mubr.msk.bf16.vlgmr.msra.gmra.mrb[4].mxu0 %vm593_vm4, %v569_v57 }
 0x3ca   :  { %1021 = vmatprep.mubr.msk.bf16.mxu0 %vm1454_vm2, %v1453_v1  ;;  %1014 = vmatpush3.bf16.msra.mxu0 %v1073_v58 }
 0x3cb   :  { %1015 = vmatprep.subr.bf16.mxu0 %v1453_v1 }
 0x3ce   :  { %1016 = vmatpush3.bf16.msra.mxu0 %v1074_v59 }
 0x3cf   :  { %1017 = vmatprep.subr.bf16.mxu0 %v1453_v1 }
 0x3d2   :  { %1018 = vmatpush3.bf16.msra.mxu0 %v1075_v60 }
 0x3d3   :  { %1019 = vmatprep.subr.bf16.mxu0 %v1453_v1 }
 0x3d6   :  { %1020 = vmatpush3.bf16.msra.mxu0 %v1076_v61 }
 0x49c   :  { %v631_v1 = vpop.f32.mrb[4].mxu0 }
 0x49d   :  { %v632_v8 = vadd.f32 %v925_v7, %v631_v1  ;;  %v1011_v9 = vpop.f32.mrb[5].mxu0 }
 0x49e   :  { %v634_v10 = vpop.f32.mrb[6].mxu0 }
 0x49f   :  { %1107 = vtanh.f32 %v632_v8  ;;  %v1012_v11 = vpop.f32.mrb[7].mxu0 }
 0x4a9   :  { %v1108_v12 = vpop.eup %1107 }
 0x4aa   :  { %v638_v13 = vpack.c.bf16 %v1108_v12, %v1108_v12 }
 0x4ac   :  { %1022 = vmatmul.mubr.msk.bf16.vlgmr.msra.gmra.mrb[8].mxu0 %vm524_vm3, %v638_v13 }
 0x57f   :  { %v715_v23 = vpop.f32.mrb[8].mxu0 }
 0x580   :  { %v716_v24 = vadd.f32 %v929_v22, %v715_v23  ;;  %v1023_v25 = vpop.f32.mrb[9].mxu0 }
 0x581   :  { %v718_v26 = vpop.f32.mrb[10].mxu0 }
 0x582   :  { %1109 = vtanh.f32 %v716_v24  ;;  %v1024_v27 = vpop.f32.mrb[11].mxu0 }
 0x58c   :  { %v1110_v28 = vpop.eup %1109 }
 0x58d   :  { %v722_v29 = vpack.c.bf16 %v1110_v28, %v1110_v28 }
 0x58f   :  { %864 = vmatmul.mubr.bf16.vlgmr.msra.gmra.mrb[8].mxu1 %v722_v29 }
 0x662   :  { %v865_v37 = vpop.f32.mrb[8].mxu1 }
 0x663   :  { %v866_v38 = vadd.f32 %v865_v37, %v744_v35  ;;  %v867_v39 = vpop.f32.mrb[9].mxu1 }
 0x664   :  { %v868_v40 = vadd.f32 %v867_v39, %v748_v36  ;;  %v869_v41 = vpop.f32.mrb[10].mxu1 }
 0x665   :  { %872 = vst [vmem:[#allocation23] sm:$0xff] %v866_v38  ;;  %v870_v42 = vpop.f32.mrb[11].mxu1 }
 0x666   :  { %873 = vst.msk [vmem:[#allocation23 + $0x8] sm:$0xff] %vm322_vm0, %v868_v40 }
 0x667   :  { %1408 = shalt.err (!%p1405_p10)
}
 0x668   :  { %s1409_s16 = scalar_lea.hbm %s1766_s13, 256 }
 0x669   :  { %p1410_p11 = scmp.ne.s32.totalorder %s1766_s13, %s1409_s16  ;;  %p1413_p12 = scmp.lt.u32.totalorder %s1409_s16, %s1766_s13 }
 0x66b   :  { %p1415_p13 = pnand %p1413_p12, %p1410_p11 }
 0x66d   :  { %1418 = shalt.err (!%p1415_p13)
}
 0x66e   :  { %883 = dma.vmem_to_hbm [thread:$0]  %s881_s21, 256, %s1766_s13, [#allocation4]  }
 0x66f   :  { %1433 = dma.done.wait [#allocation4], 256  }
 0x670   :  { %1434 = vsyncadd [#allocation4], 4294967040 }
 0x671   :  { %887 = vsyncpa [#allocation3], 1 }
 0x672   :  { %888 = vsyncpa [#allocation6], 1 }
 0x673   :  { %889 = vsyncpa [#allocation9], 1 }
 0x674   :  { %890 = vsyncpa [#allocation12], 1 }
 0x675   :  { %891 = vsyncpa [#allocation15], 1 }
 0x676   :  { %892 = vsyncpa [#allocation18], 1 }
 0x677   :  { %893 = vsyncpa [#allocation21], 1 }
 0x678   :  { %894 = vsyncpa [#allocation4], 1 }

</bundles_post_ra>
